<compile_context>
chip_gen: v6e
topology: v6e:2x2x1
jax: 0.10.0
libtpu: 0.0.40
codegen_flags: <defaults>
</compile_context>

<pallas_src>
import math
import jax
import jax.numpy as jnp
from jax.experimental import pallas as pl
from jax.experimental.pallas import tpu as pltpu


# ---------------------------------------------------------------------------
# Kernels
# ---------------------------------------------------------------------------
def _linear_kernel_single_k(x_ref, w_ref, b_ref, o_ref):
    # Whole reduction in one block: x_ref (TM, K), w_ref (TN, K), b_ref (1, TN)
    acc = jax.lax.dot_general(
        x_ref[...],
        w_ref[...],
        dimension_numbers=(((1,), (1,)), ((), ())),   # contract last dims (x @ w.T)
        preferred_element_type=jnp.float32,
    )
    o_ref[...] = (acc + b_ref[...].astype(jnp.float32)).astype(o_ref.dtype)


def _linear_kernel_multi_k(x_ref, w_ref, b_ref, o_ref, acc_ref):
    # x_ref: (TM, TK)  w_ref: (TN, TK)  b_ref: (1, TN)
    # o_ref: (TM, TN)  acc_ref: (TM, TN) f32 scratch
    @pl.when(pl.program_id(2) == 0)
    def _init():
        acc_ref[...] = jnp.zeros_like(acc_ref)

    acc_ref[...] += jax.lax.dot_general(
        x_ref[...],
        w_ref[...],
        dimension_numbers=(((1,), (1,)), ((), ())),
        preferred_element_type=jnp.float32,
    )

    @pl.when(pl.program_id(2) == pl.num_programs(2) - 1)
    def _finalize():
        o_ref[...] = (acc_ref[...] + b_ref[...].astype(jnp.float32)).astype(o_ref.dtype)


# ---------------------------------------------------------------------------
# Tile selection
# ---------------------------------------------------------------------------
def _pick_tile_m(m, tile_m):
    # Ragged M edge blocks are masked on write, so any 8-aligned tile works.
    if m <= tile_m:
        return m
    return max(8, (tile_m // 8) * 8)


def _pick_tile_n(n, tile_n):
    # Ragged N edge blocks are masked on write; keep tiles lane-dense (x128)
    # when out_dim is large enough, otherwise the full dim (always legal).
    if n <= tile_n:
        return n
    return max(128, (tile_n // 128) * 128)


def _pick_tile_k(k, tile_k):
    # K is the reduction axis: the tile MUST divide in_dim exactly.
    if k <= tile_k:
        return k
    c = max(128, (tile_k // 128) * 128)
    while c >= 128:
        if k % c == 0:
            return c
        c -= 128
    return k  # no 128-aligned divisor: keep the whole reduction resident


# ---------------------------------------------------------------------------
# Wrapper
# ---------------------------------------------------------------------------
def linear_norm(x, weight, bias=None, *, tile_m=512, tile_n=512, tile_k=512):
    """y = x @ weight.T + bias (torch.nn.Linear semantics).

    x:      (..., in_dim)
    weight: (out_dim, in_dim)   (PyTorch convention, used as-is)
    bias:   (out_dim,) or None
    """
    in_dim = x.shape[-1]
    out_dim, w_in = weight.shape
    assert w_in == in_dim, "weight must be (out_dim, in_dim)"

    lead_shape = x.shape[:-1]
    m = int(math.prod(lead_shape)) if lead_shape else 1

    x2d = x.reshape(m, in_dim)
    if bias is None:
        bias = jnp.zeros((out_dim,), dtype=x.dtype)
    b2d = bias.reshape(1, out_dim)

    tm = _pick_tile_m(m, tile_m)
    tn = _pick_tile_n(out_dim, tile_n)
    tk = _pick_tile_k(in_dim, tile_k)

    itemsize = jnp.dtype(x.dtype).itemsize
    cost = pl.CostEstimate(
        flops=2 * m * out_dim * in_dim,
        transcendentals=0,
        bytes_accessed=(m * in_dim + out_dim * in_dim + out_dim) * itemsize
        + m * out_dim * itemsize,
    )
    cparams = pltpu.CompilerParams(
        dimension_semantics=("parallel", "parallel")
        if tk == in_dim
        else ("parallel", "parallel", "arbitrary"),
        vmem_limit_bytes=48 * 1024 * 1024,
    )

    if tk == in_dim:
        # Fast path: whole reduction in one block -> no scratch accumulator.
        grid = (pl.cdiv(m, tm), pl.cdiv(out_dim, tn))
        out = pl.pallas_call(
            _linear_kernel_single_k,
            out_shape=jax.ShapeDtypeStruct((m, out_dim), x.dtype),
            grid_spec=pltpu.PrefetchScalarGridSpec(
                num_scalar_prefetch=0,
                grid=grid,
                in_specs=[
                    pl.BlockSpec((tm, in_dim), lambda i, j: (i, 0)),   # x
                    pl.BlockSpec((tn, in_dim), lambda i, j: (j, 0)),   # weight
                    pl.BlockSpec((1, tn), lambda i, j: (0, j)),        # bias
                ],
                out_specs=pl.BlockSpec((tm, tn), lambda i, j: (i, j)),
            ),
            compiler_params=cparams,
            cost_estimate=cost,
        )(x2d, weight, b2d)
    else:
        # General path: 3-D grid with f32 accumulator across the K axis.
        grid = (pl.cdiv(m, tm), pl.cdiv(out_dim, tn), in_dim // tk)
        out = pl.pallas_call(
            _linear_kernel_multi_k,
            out_shape=jax.ShapeDtypeStruct((m, out_dim), x.dtype),
            grid_spec=pltpu.PrefetchScalarGridSpec(
                num_scalar_prefetch=0,
                grid=grid,
                in_specs=[
                    pl.BlockSpec((tm, tk), lambda i, j, k: (i, k)),    # x
                    pl.BlockSpec((tn, tk), lambda i, j, k: (j, k)),    # weight
                    pl.BlockSpec((1, tn), lambda i, j, k: (0, j)),     # bias
                ],
                out_specs=pl.BlockSpec((tm, tn), lambda i, j, k: (i, j)),
                scratch_shapes=[pltpu.VMEM((tm, tn), jnp.float32)],
            ),
            compiler_params=cparams,
            cost_estimate=cost,
        )(x2d, weight, b2d)

    return out.reshape(*lead_shape, out_dim)


# ---------------------------------------------------------------------------
# Param init matching the PyTorch module
# ---------------------------------------------------------------------------
def init_linear_norm_params(key, in_dim, out_dim, w_init_gain="linear"):
    """Xavier-uniform weight init (gain('linear') == 1.0), torch-default bias."""
    gain = 1.0  # torch.nn.init.calculate_gain('linear') == 1.0
    bound = gain * math.sqrt(6.0 / (in_dim + out_dim))
    k_w, k_b = jax.random.split(key)
    weight = jax.random.uniform(
        k_w, (out_dim, in_dim), minval=-bound, maxval=bound, dtype=jnp.float32
    )
    b_bound = 1.0 / math.sqrt(in_dim)
    bias = jax.random.uniform(
        k_b, (out_dim,), minval=-b_bound, maxval=b_bound, dtype=jnp.float32
    )
    return weight, bias


if __name__ == "__main__":
    key = jax.random.PRNGKey(0)
    k_x, k_p, k_x2, k_p2 = jax.random.split(key, 4)

    # Small demo at module-typical shapes (fast single-K-block path).
    batch, seq, in_dim, out_dim = 2, 8, 32, 64
    x = jax.random.normal(k_x, (batch, seq, in_dim), dtype=jnp.float32)
    weight, bias = init_linear_norm_params(k_p, in_dim, out_dim)

    y = jax.block_until_ready(linear_norm(x, weight, bias))
    y_ref = (
        jnp.dot(x.reshape(-1, in_dim), weight.T, precision=jax.lax.Precision.HIGHEST)
        + bias
    ).reshape(batch, seq, out_dim)
    assert y.shape == (batch, seq, out_dim)
    assert jnp.allclose(y, y_ref, atol=1e-5, rtol=1e-5)

    # Second check: forces the tiled M/N/K accumulator path with small tiles
    # (ragged M and N edge blocks, multi-step K reduction) while staying small.
    b2, s2, in2, out2 = 2, 160, 256, 192
    x2 = jax.random.normal(k_x2, (b2, s2, in2), dtype=jnp.float32)
    w2, bi2 = init_linear_norm_params(k_p2, in2, out2)

    y2 = jax.block_until_ready(
        linear_norm(x2, w2, bi2, tile_m=128, tile_n=128, tile_k=128)
    )
    y2_ref = (
        jnp.dot(x2.reshape(-1, in2), w2.T, precision=jax.lax.Precision.HIGHEST) + bi2
    ).reshape(b2, s2, out2)
    assert y2.shape == (b2, s2, out2)
    assert jnp.allclose(y2, y2_ref, atol=1e-4, rtol=1e-4)

    print("KERNEL_OK")
</pallas_src>

<mosaic_0001>
module attributes {stable_mosaic.version = 11 : i64} {
  func.func @_linear_kernel_single_k(%arg0: i32, %arg1: i32, %arg2: memref<16x32xf32, #tpu.memory_space<vmem>>, %arg3: memref<64x32xf32, #tpu.memory_space<vmem>>, %arg4: memref<1x64xf32, #tpu.memory_space<vmem>>, %arg5: memref<16x64xf32, #tpu.memory_space<vmem>>) attributes {dimension_semantics = [#tpu.dimension_semantics<parallel>, #tpu.dimension_semantics<parallel>], iteration_bounds = array<i64: 1, 1>, scalar_prefetch = 0 : i64, scratch_operands = 0 : i64, tpu.core_type = #tpu.core_type<tc>, window_params = [{transform_indices = @transform_0, window_bounds = array<i64: 16, 32>}, {transform_indices = @transform_1, window_bounds = array<i64: 64, 32>}, {transform_indices = @transform_2, window_bounds = array<i64: 1, 64>}, {transform_indices = @transform_3, window_bounds = array<i64: 16, 64>}]} {
    %c0 = arith.constant 0 : index
    %c0_0 = arith.constant 0 : index
    %0 = vector.load %arg2[%c0, %c0_0] : memref<16x32xf32, #tpu.memory_space<vmem>>, vector<16x32xf32>
    %c0_1 = arith.constant 0 : index
    %c0_2 = arith.constant 0 : index
    %1 = vector.load %arg3[%c0_1, %c0_2] : memref<64x32xf32, #tpu.memory_space<vmem>>, vector<64x32xf32>
    %cst = arith.constant dense<0.000000e+00> : vector<16x64xf32>
    %2 = tpu.matmul %0, %1, %cst {dimension_numbers = #tpu.dot_dimension_numbers<[1], [1], [0], [0], [0, 0, 1, 0], [], []>} : vector<16x32xf32>, vector<64x32xf32>, vector<16x64xf32> -> vector<16x64xf32>
    %c0_3 = arith.constant 0 : index
    %c0_4 = arith.constant 0 : index
    %3 = vector.load %arg4[%c0_3, %c0_4] : memref<1x64xf32, #tpu.memory_space<vmem>>, vector<1x64xf32>
    %4 = vector.broadcast %3 : vector<1x64xf32> to vector<16x64xf32>
    %5 = arith.addf %2, %4 : vector<16x64xf32>
    %c0_5 = arith.constant 0 : index
    %c0_6 = arith.constant 0 : index
    %6 = vector.load %arg5[%c0_5, %c0_6] : memref<16x64xf32, #tpu.memory_space<vmem>>, vector<16x64xf32>
    tpu.vector_store %arg5[%c0_5, %c0_6], %5 {strides = array<i32>} : memref<16x64xf32, #tpu.memory_space<vmem>>, vector<16x64xf32>,
    return
  }
  func.func @transform_0(%arg0: i32, %arg1: i32) -> (i32, i32) {
    %c0_i32 = arith.constant 0 : i32
    %c0_i32_0 = arith.constant 0 : i32
    return %arg0, %c0_i32 : i32, i32
  }
  func.func @transform_1(%arg0: i32, %arg1: i32) -> (i32, i32) {
    %c0_i32 = arith.constant 0 : i32
    %c0_i32_0 = arith.constant 0 : i32
    return %arg1, %c0_i32 : i32, i32
  }
  func.func @transform_2(%arg0: i32, %arg1: i32) -> (i32, i32) {
    %c0_i32 = arith.constant 0 : i32
    %c0_i32_0 = arith.constant 0 : i32
    return %c0_i32, %arg1 : i32, i32
  }
  func.func @transform_3(%arg0: i32, %arg1: i32) -> (i32, i32) {
    %c0_i32 = arith.constant 0 : i32
    return %arg0, %arg1 : i32, i32
  }
}

</mosaic_0001>

<bundles_post_ra>
// kernel: tpu_custom_call.1
= control target key start
LH: loop header
LB: loop body
LE: loop exit
PB: predicated region body
PF: predicated region fallthrough
CT: control target
= control target key end

     0   :  { %vm32_vm0 = vcmask 261120   ;;  %s299_s0 = inlined_call_operand.vmem [shape: f32[16,32], index: 0, kind: input, shape index: {}]   ;;  %s300_s1 = inlined_call_operand.vmem [shape: f32[64,32], index: 1, kind: input, shape index: {}]   ;;  %s301_s2 = inlined_call_operand.vmem [shape: f32[1,64], index: 2, kind: input, shape index: {}]   ;;  %s302_s3 = inlined_call_operand.hbm [shape: f32[16,64], index: 3, kind: output, shape index: {}]  }
   0x1   :  { %v24_v0 = vld [vmem:[%s300_s1 + $0x38] sm:$0xff]  ;;  %v23_v1 = vld [vmem:[%s300_s1 + $0x30] sm:$0xff]  ;;  %v15_v2 = vld [vmem:[%s299_s0] sm:$0xff] }
   0x2   :  { %178 = vmatprep.subr.msk.mxu0 %vm32_vm0, %v24_v0  ;;  %194 = vmatprep.mubr.msk.f32.mxu0 %vm32_vm0, %v15_v2 }
   0x3   :  { %179 = vmatpush3.xpose.msk.msra.mxu0 %vm32_vm0, %v24_v0 }
   0x4   :  { %180 = vmatprep.subr.msk.mxu0 %vm32_vm0, %v23_v1 }
   0x5   :  { %8 = vsyncpa [#allocation3], 0  ;;  %v22_v3 = vld [vmem:[%s300_s1 + $0x28] sm:$0xff]  ;;  %v21_v4 = vld [vmem:[%s300_s1 + $0x20] sm:$0xff]  ;;  %s222_s7 = smov [#allocation2]   ;;  %vm138_vm1 = vcmask 523264  }
   0x6   :  { %v20_v5 = vld [vmem:[%s300_s1 + $0x18] sm:$0xff]  ;;  %v19_v6 = vld [vmem:[%s300_s1 + $0x10] sm:$0xff]  ;;  %v18_v7 = vld [vmem:[%s300_s1 + $0x8] sm:$0xff]  ;;  %s146_s8 = sshll.u32 %s222_s7, 4  ;;  %s147_s8 = int_to_ptr.vmem [resolvable:$true] %s146_s8 }
   0x7   :  { %181 = vmatpush3.xpose.msk.msra.mxu0 %vm32_vm0, %v23_v1  ;;  %v17_v8 = vld [vmem:[%s300_s1] sm:$0xff]  ;;  %v16_v9 = vld [vmem:[%s299_s0 + $0x8] sm:$0xff]  ;;  %s200_s1 = scalar_lea.vmem %s147_s8, 256  ;;  %p205_p1 = scmp.lt.s32.totalorder %s147_s8, %s147_s8 }
   0x8   :  { %182 = vmatprep.subr.msk.mxu0 %vm32_vm0, %v22_v3  ;;  %v157_v10 = vld [vmem:[%s301_s2] ss:$0 sm:$0xff]  ;;  %p201_p0 = scmp.ne.s32.totalorder %s147_s8, %s200_s1  ;;  %p206_p2 = scmp.lt.s32.totalorder %s200_s1, %s200_s1 }
   0xa   :  { %p207_p3 = por %p206_p2, %p205_p1 }
   0xb   :  { %183 = vmatpush3.xpose.msk.msra.mxu0 %vm32_vm0, %v22_v3 }
   0xc   :  { %184 = vmatprep.subr.msk.mxu0 %vm32_vm0, %v21_v4  ;;  %p208_p4 = pnand %p207_p3, %p201_p0 }
   0xf   :  { %185 = vmatpush3.xpose.msk.msra.mxu0 %vm32_vm0, %v21_v4 }
  0x10   :  { %186 = vmatprep.subr.msk.mxu0 %vm32_vm0, %v20_v5 }
  0x13   :  { %187 = vmatpush3.xpose.msk.msra.mxu0 %vm32_vm0, %v20_v5 }
  0x14   :  { %188 = vmatprep.subr.msk.mxu0 %vm32_vm0, %v19_v6 }
  0x17   :  { %189 = vmatpush3.xpose.msk.msra.mxu0 %vm32_vm0, %v19_v6 }
  0x18   :  { %190 = vmatprep.subr.msk.mxu0 %vm32_vm0, %v18_v7 }
  0x1b   :  { %191 = vmatpush3.xpose.msk.msra.mxu0 %vm32_vm0, %v18_v7 }
  0x1c   :  { %192 = vmatprep.subr.msk.mxu0 %vm32_vm0, %v17_v8 }
  0x1f   :  { %193 = vmatpush3.xpose.msk.msra.mxu0 %vm32_vm0, %v17_v8 }
  0x22   :  { %195 = vmatmul.mubr.msk.f32.vlgmr.msra.gmra.mxu0 %vm32_vm0, %v16_v9 }
  0xe2   :  { %v196_v11 = vpop.f32.mrf.mxu0 }
  0xe3   :  { %v135_v12 = vadd.f32 %v196_v11, %v157_v10 }
  0xe4   :  { %v129_v13 = vpop.f32.mrf.mxu0 }
  0xe5   :  { %140 = vst.msk [vmem:[#allocation2 + $0x8] sm:$0xff] %vm138_vm1, %v135_v12  ;;  %v130_v14 = vadd.f32 %v157_v10, %v129_v13 }
  0xe7   :  { %139 = vst.msk [vmem:[#allocation2] sm:$0xff] %vm138_vm1, %v130_v14 }
  0xe8   :  { %211 = shalt.err (!%p208_p4)
}
  0xe9   :  { %s223_s0 = smov 128   ;;  %s224_s9 = smov 8  }
  0xea   :  { %152 = dma.vmem_to_hbm [thread:$0]  %s147_s8, 256, %s302_s3, [#allocation3], %s223_s0, %s223_s0, %s224_s9  }
  0xeb   :  { %220 = dma.done.wait [#allocation3], 256  }
  0xec   :  { %221 = vsyncadd [#allocation3], 4294967040 }
  0xed   :  { %156 = vsyncpa [#allocation3], 1 }

</bundles_post_ra>
